<compile_context>
chip_gen: v6e
topology: v6e:2x2x1
jax: 0.10.0
libtpu: 0.0.40
codegen_flags: <defaults>
</compile_context>

<pallas_src>
import math

import numpy as np
import jax
import jax.numpy as jnp
from jax.experimental import pallas as pl
from jax.experimental.pallas import tpu as pltpu

_LANES = 128
_NEG_HALF_LOG_2PI = -0.5 * math.log(2.0 * math.pi)


def _normal_log_prob_kernel(loc_ref, scale_ref, z_ref, out_ref):
    loc = loc_ref[...]
    scale = scale_ref[...]
    z = z_ref[...]
    # -0.5*log(2*pi*var) - (z-loc)^2/(2*var),  var = scale^2
    #   = -0.5*log(2*pi) - log|scale| - 0.5*((z - loc) * (1/scale))^2
    inv_scale = pl.reciprocal(scale, approx=False)          # exact 1/x
    diff = (z - loc) * inv_scale
    out_ref[...] = (_NEG_HALF_LOG_2PI - jnp.log(jnp.abs(scale))) \
        - 0.5 * (diff * diff)


def _round_up(x, m):
    return ((x + m - 1) // m) * m


def normal_log_prob(loc, scale, z, *, block_rows=512):
    """Elementwise Normal log-density with numpy-style broadcasting.

    Semantics match NormalLogProb.forward(loc, scale, z).
    """
    out_shape = jnp.broadcast_shapes(jnp.shape(loc), jnp.shape(scale),
                                     jnp.shape(z))
    n = int(np.prod(out_shape)) if out_shape else 1

    # Lane-dense 2D slab: (rows, 128) with rows a multiple of 8 (or of the
    # block size when a grid is needed). Tail padding is sliced off at the end.
    rows = _round_up(max(pl.cdiv(n, _LANES), 1), 8)
    if rows > block_rows:
        rows = _round_up(rows, block_rows)
        br = block_rows
    else:
        br = rows
    grid_rows = rows // br
    n_pad = rows * _LANES

    def prep(v, fill):
        v = jnp.broadcast_to(jnp.asarray(v, jnp.float32), out_shape).reshape(-1)
        return jnp.pad(v, (0, n_pad - n),
                       constant_values=fill).reshape(rows, _LANES)

    loc2 = prep(loc, 0.0)
    scale2 = prep(scale, 1.0)   # finite padding: log/reciprocal stay well-defined
    z2 = prep(z, 0.0)

    out2 = pl.pallas_call(
        _normal_log_prob_kernel,
        out_shape=jax.ShapeDtypeStruct((rows, _LANES), jnp.float32),
        grid_spec=pltpu.PrefetchScalarGridSpec(
            num_scalar_prefetch=0,
            grid=(grid_rows,),
            in_specs=[pl.BlockSpec((br, _LANES), lambda i: (i, 0))] * 3,
            out_specs=pl.BlockSpec((br, _LANES), lambda i: (i, 0)),
        ),
        compiler_params=pltpu.CompilerParams(
            dimension_semantics=("parallel",)),
    )(loc2, scale2, z2)

    return out2.reshape(-1)[:n].reshape(out_shape)


def _reference(loc, scale, z):
    var = scale ** 2
    return -0.5 * jnp.log(2.0 * jnp.pi * var) - (z - loc) ** 2 / (2.0 * var)


if __name__ == "__main__":
    key = jax.random.PRNGKey(0)
    k_loc, k_scale, k_z = jax.random.split(key, 3)

    # VAE-style usage: per-batch loc/scale broadcast over the samples axis.
    batch, n_samples, latent = 8, 4, 16
    loc = jax.random.normal(k_loc, (batch, 1, latent), jnp.float32)
    scale = 0.5 + jax.nn.softplus(
        jax.random.normal(k_scale, (batch, 1, latent), jnp.float32))
    z = jax.random.normal(k_z, (batch, n_samples, latent), jnp.float32)

    out = normal_log_prob(loc, scale, z)
    jax.block_until_ready(out)

    ref = _reference(loc, scale, z)
    assert out.shape == ref.shape == (batch, n_samples, latent)
    assert jnp.allclose(out, ref, atol=1e-4, rtol=1e-5)

    # Same-shape call (paritybench-style: three equal-shaped tensors).
    a = jax.random.uniform(k_loc, (4, 4, 4, 4), jnp.float32)
    s = jax.random.uniform(k_scale, (4, 4, 4, 4), jnp.float32) + 0.1
    b = jax.random.uniform(k_z, (4, 4, 4, 4), jnp.float32)
    out2 = normal_log_prob(a, s, b)
    jax.block_until_ready(out2)
    assert jnp.allclose(out2, _reference(a, s, b), atol=1e-4, rtol=1e-5)

    print("KERNEL_OK")
</pallas_src>

<mosaic_0001>
module attributes {stable_mosaic.version = 11 : i64} {
  func.func @_normal_log_prob_kernel(%arg0: i32, %arg1: memref<8x128xf32, #tpu.memory_space<vmem>>, %arg2: memref<8x128xf32, #tpu.memory_space<vmem>>, %arg3: memref<8x128xf32, #tpu.memory_space<vmem>>, %arg4: memref<8x128xf32, #tpu.memory_space<vmem>>) attributes {dimension_semantics = [#tpu.dimension_semantics<parallel>], iteration_bounds = array<i64: 1>, scalar_prefetch = 0 : i64, scratch_operands = 0 : i64, tpu.core_type = #tpu.core_type<tc>, window_params = [{transform_indices = @transform_0, window_bounds = array<i64: 8, 128>}, {transform_indices = @transform_1, window_bounds = array<i64: 8, 128>}, {transform_indices = @transform_2, window_bounds = array<i64: 8, 128>}, {transform_indices = @transform_3, window_bounds = array<i64: 8, 128>}]} {
    %c0 = arith.constant 0 : index
    %c0_0 = arith.constant 0 : index
    %0 = vector.load %arg1[%c0, %c0_0] : memref<8x128xf32, #tpu.memory_space<vmem>>, vector<8x128xf32>
    %c0_1 = arith.constant 0 : index
    %c0_2 = arith.constant 0 : index
    %1 = vector.load %arg2[%c0_1, %c0_2] : memref<8x128xf32, #tpu.memory_space<vmem>>, vector<8x128xf32>
    %c0_3 = arith.constant 0 : index
    %c0_4 = arith.constant 0 : index
    %2 = vector.load %arg3[%c0_3, %c0_4] : memref<8x128xf32, #tpu.memory_space<vmem>>, vector<8x128xf32>
    %3 = tpu.reciprocal %1 : vector<8x128xf32> -> vector<8x128xf32>
    %4 = arith.subf %2, %0 : vector<8x128xf32>
    %5 = arith.mulf %4, %3 : vector<8x128xf32>
    %6 = math.absf %1 : vector<8x128xf32>
    %7 = math.log %6 : vector<8x128xf32>
    %cst = arith.constant -0.918938517 : f32
    %8 = vector.broadcast %cst : f32 to vector<8x128xf32>
    %9 = arith.subf %8, %7 : vector<8x128xf32>
    %10 = arith.mulf %5, %5 : vector<8x128xf32>
    %cst_5 = arith.constant 5.000000e-01 : f32
    %11 = vector.broadcast %cst_5 : f32 to vector<8x128xf32>
    %12 = arith.mulf %11, %10 : vector<8x128xf32>
    %13 = arith.subf %9, %12 : vector<8x128xf32>
    %c0_6 = arith.constant 0 : index
    %c0_7 = arith.constant 0 : index
    %14 = vector.load %arg4[%c0_6, %c0_7] : memref<8x128xf32, #tpu.memory_space<vmem>>, vector<8x128xf32>
    tpu.vector_store %arg4[%c0_6, %c0_7], %13 {strides = array<i32>} : memref<8x128xf32, #tpu.memory_space<vmem>>, vector<8x128xf32>,
    return
  }
  func.func @transform_0(%arg0: i32) -> (i32, i32) {
    %c0_i32 = arith.constant 0 : i32
    %c0_i32_0 = arith.constant 0 : i32
    return %arg0, %c0_i32 : i32, i32
  }
  func.func @transform_1(%arg0: i32) -> (i32, i32) {
    %c0_i32 = arith.constant 0 : i32
    %c0_i32_0 = arith.constant 0 : i32
    return %arg0, %c0_i32 : i32, i32
  }
  func.func @transform_2(%arg0: i32) -> (i32, i32) {
    %c0_i32 = arith.constant 0 : i32
    %c0_i32_0 = arith.constant 0 : i32
    return %arg0, %c0_i32 : i32, i32
  }
  func.func @transform_3(%arg0: i32) -> (i32, i32) {
    %c0_i32 = arith.constant 0 : i32
    %c0_i32_0 = arith.constant 0 : i32
    return %arg0, %c0_i32 : i32, i32
  }
}

</mosaic_0001>

<bundles_post_ra>
// kernel: tpu_custom_call.1
= control target key start
LH: loop header
LB: loop body
LE: loop exit
PB: predicated region body
PF: predicated region fallthrough
CT: control target
= control target key end

     0   :  { %8 = vsyncpa [#allocation3], 0  ;;  %s210_s0 = inlined_call_operand.hbm [shape: f32[8,128], index: 0, kind: input, shape index: {}]   ;;  %s211_s1 = inlined_call_operand.hbm [shape: f32[8,128], index: 1, kind: input, shape index: {}]   ;;  %s212_s2 = inlined_call_operand.hbm [shape: f32[8,128], index: 2, kind: input, shape index: {}]   ;;  %s213_s3 = inlined_call_operand.hbm [shape: f32[8,128], index: 3, kind: output, shape index: {}]  }
   0x1   :  { %9 = vsyncpa [#allocation6], 0 }
   0x2   :  { %10 = vsyncpa [#allocation4], 0  ;;  %s174_s12 = smov [#allocation5]   ;;  %s175_s14 = smov [#allocation2]  }
   0x3   :  { %s27_s13 = sshll.u32 %s174_s12, 4  ;;  %s17_s15 = sshll.u32 %s175_s14, 4  ;;  %s28_s13 = int_to_ptr.vmem [resolvable:$true] %s27_s13  ;;  %s18_s15 = int_to_ptr.vmem [resolvable:$true] %s17_s15 }
   0x4   :  { %s96_s16 = scalar_lea.vmem %s28_s13, 128  ;;  %p101_p1 = scmp.lt.s32.totalorder %s28_s13, %s28_s13 }
   0x5   :  { %p97_p0 = scmp.ne.s32.totalorder %s28_s13, %s96_s16  ;;  %p102_p2 = scmp.lt.s32.totalorder %s96_s16, %s96_s16 }
   0x7   :  { %p103_p3 = por %p102_p2, %p101_p1 }
   0x9   :  { %p104_p4 = pnand %p103_p3, %p97_p0 }
   0xb   :  { %107 = shalt.err (!%p104_p4)
}
   0xc   :  { %30 = dma.hbm_to_vmem [thread:$0]  %s211_s1, 128, %s28_s13, [#allocation6]  }
   0xd   :  { %s116_s19 = scalar_lea.vmem %s18_s15, 128  ;;  %p121_p6 = scmp.lt.s32.totalorder %s18_s15, %s18_s15 }
   0xe   :  { %p117_p5 = scmp.ne.s32.totalorder %s18_s15, %s116_s19  ;;  %p122_p7 = scmp.lt.s32.totalorder %s116_s19, %s116_s19 }
  0x10   :  { %p123_p8 = por %p122_p7, %p121_p6 }
  0x12   :  { %p124_p9 = pnand %p123_p8, %p117_p5 }
  0x14   :  { %127 = shalt.err (!%p124_p9)
}
  0x15   :  { %20 = dma.hbm_to_vmem [thread:$0]  %s210_s0, 128, %s18_s15, [#allocation3]  }
  0x16   :  { %s176_s22 = smov [#allocation7]  }
  0x17   :  { %s37_s23 = sshll.u32 %s176_s22, 4  ;;  %s38_s23 = int_to_ptr.vmem [resolvable:$true] %s37_s23 }
  0x18   :  { %s136_s24 = scalar_lea.vmem %s38_s23, 128  ;;  %p141_p11 = scmp.lt.s32.totalorder %s38_s23, %s38_s23 }
  0x19   :  { %p137_p10 = scmp.ne.s32.totalorder %s38_s23, %s136_s24  ;;  %p142_p12 = scmp.lt.s32.totalorder %s136_s24, %s136_s24 }
  0x1b   :  { %p143_p13 = por %p142_p12, %p141_p11 }
  0x1d   :  { %p144_p0 = pnand %p143_p13, %p137_p10 }
  0x1f   :  { %147 = shalt.err (!%p144_p0)
}
  0x20   :  { %40 = dma.hbm_to_vmem [thread:$0]  %s212_s2, 128, %s38_s23, [#allocation6]  }
  0x21   :  { %168 = dma.done.wait [#allocation3], 128  }
  0x22   :  { %169 = vsyncadd [#allocation3], 4294967168 }
  0x23   :  { %170 = dma.done.wait [#allocation6], 256  }
  0x24   :  { %171 = vsyncadd [#allocation6], 4294967040  ;;  %v51_v0 = vld [vmem:[#allocation5] sm:$0xff]  ;;  %v50_v2 = vld [vmem:[#allocation2] sm:$0xff]  ;;  %s177_s0 = smov [#allocation8]  }
  0x25   :  { %84 = vrcp.f32 %v51_v0  ;;  %v56_v1 = vand.u32 2147483647, %v51_v0  ;;  %v52_v3 = vld [vmem:[#allocation7] sm:$0xff]  ;;  %s70_s26 = sshll.u32 %s177_s0, 4  ;;  %s71_s26 = int_to_ptr.vmem [resolvable:$true] %s70_s26 }
  0x26   :  { %v54_v4 = vsub.f32 %v52_v3, %v50_v2  ;;  %s148_s2 = scalar_lea.vmem %s71_s26, 128  ;;  %p153_p2 = scmp.lt.s32.totalorder %s71_s26, %s71_s26 }
  0x27   :  { %86 = vlog2.f32 %v56_v1  ;;  %p149_p1 = scmp.ne.s32.totalorder %s71_s26, %s148_s2  ;;  %p154_p3 = scmp.lt.s32.totalorder %s148_s2, %s148_s2 }
  0x29   :  { %p155_p4 = por %p154_p3, %p153_p2 }
  0x2b   :  { %p156_p5 = pnand %p155_p4, %p149_p1 }
  0x32   :  { %v85_v5 = vpop.eup %84 }
  0x33   :  { %v55_v6 = vmul.f32 %v85_v5, %v54_v4 }
  0x34   :  { %v87_v7 = vpop.eup %86 }
  0x35   :  { %v58_v8 = vmul.f32 0.6931472, %v87_v7  ;;  %v60_v9 = vmul.f32 %v55_v6, %v55_v6 }
  0x37   :  { %v59_v10 = vsub.f32 -0.9189385, %v58_v8  ;;  %v61_v11 = vmul.f32 0.5, %v60_v9 }
  0x39   :  { %v62_v12 = vsub.f32 %v59_v10, %v61_v11 }
  0x3b   :  { %63 = vst [vmem:[#allocation8] sm:$0xff] %v62_v12 }
  0x3c   :  { %159 = shalt.err (!%p156_p5)
}
  0x3d   :  { %73 = dma.vmem_to_hbm [thread:$0]  %s71_s26, 128, %s213_s3, [#allocation4]  }
  0x3e   :  { %172 = dma.done.wait [#allocation4], 128  }
  0x3f   :  { %173 = vsyncadd [#allocation4], 4294967168 }
  0x40   :  { %77 = vsyncpa [#allocation3], 1 }
  0x41   :  { %78 = vsyncpa [#allocation6], 1 }
  0x42   :  { %79 = vsyncpa [#allocation4], 1 }

</bundles_post_ra>
